<compile_context>
chip_gen: v6e
topology: v6e:2x2x1
jax: 0.10.0
libtpu: 0.0.40
codegen_flags: <defaults>
</compile_context>

<pallas_src>
import jax
import jax.numpy as jnp
from jax.experimental import pallas as pl
from jax.experimental.pallas import tpu as pltpu


def _mul_table_kernel(x_ref, o_ref):
    # x_ref block: (3, tm, W)  -- the three leading planes for this row-tile
    # o_ref block: (tm, W)
    o_ref[...] = x_ref[0] * x_ref[1] * x_ref[2]


def _choose_row_tile(H, W, itemsize):
    """Pick the row-tile size tm for a lane-dense (tm, W) block."""
    # Sublane packing multiple: fp32 -> 8, bf16 -> 16, int8/fp8 -> 32.
    sub = max(8, 32 // max(1, itemsize))
    # ~2 MiB per plane tile => double-buffered (3 in + 1 out) ~= 16 MiB VMEM.
    per_plane_budget = 2 * 1024 * 1024
    tm_target = max(sub, per_plane_budget // max(1, W * itemsize))

    if tm_target >= H:
        # Whole row axis fits in one block (full-dim block is always legal).
        tm = H
        # Keep >= 2 grid steps when possible so v7x can use both TensorCores.
        if H >= 2 * sub:
            half = -(-H // 2)
            tm = -(-half // sub) * sub
    else:
        tm = max(sub, (tm_target // sub) * sub)
    return tm


def mul_table_forward(x):
    """x: (S, ...) with S >= 3. Returns x[0] * x[1] * x[2] (shape x.shape[1:])."""
    assert x.ndim >= 2, "mul_table expects at least a 2-D input (S, ...)"
    S = x.shape[0]
    assert S >= 3, "mul_table needs at least 3 slices along the leading axis"

    trailing = x.shape[1:]
    W = trailing[-1]
    H = 1
    for d in trailing[:-1]:
        H *= d
    x3 = x.reshape(S, H, W)

    itemsize = jnp.dtype(x.dtype).itemsize
    tm = _choose_row_tile(H, W, itemsize)
    tn = W  # full width: lane-dense stores, single big DMA per plane
    grid = (pl.cdiv(H, tm),)

    out = pl.pallas_call(
        _mul_table_kernel,
        out_shape=jax.ShapeDtypeStruct((H, W), x.dtype),
        grid_spec=pl.GridSpec(
            grid=grid,
            in_specs=[
                # All 3 leading planes plus the i-th row tile, full width.
                pl.BlockSpec((3, tm, tn), lambda i: (0, i, 0)),
            ],
            out_specs=pl.BlockSpec((tm, tn), lambda i: (i, 0)),
        ),
        compiler_params=pltpu.CompilerParams(
            dimension_semantics=("parallel",),
            vmem_limit_bytes=32 * 1024 * 1024,
        ),
    )(x3)
    return out.reshape(trailing)


if __name__ == "__main__":
    key = jax.random.PRNGKey(0)
    k1, k2 = jax.random.split(key)

    # Primary case: (S, H, W) with S > 3 and a ragged H (exercises cdiv
    # padding of the last row block) and lane-dense W (multiple of 128).
    x = jax.random.normal(k1, (4, 20, 384), dtype=jnp.float32)
    out = jax.block_until_ready(mul_table_forward(x))
    ref = x[0] * x[1] * x[2]
    assert out.shape == ref.shape and out.dtype == ref.dtype
    assert jnp.allclose(out, ref, atol=1e-6, rtol=1e-6)

    # bf16 case: sublane multiple of 16 is picked automatically.
    xb = jax.random.normal(k2, (3, 64, 256), dtype=jnp.bfloat16)
    outb = jax.block_until_ready(mul_table_forward(xb))
    refb = xb[0] * xb[1] * xb[2]
    assert outb.shape == refb.shape and outb.dtype == refb.dtype
    assert jnp.allclose(outb.astype(jnp.float32), refb.astype(jnp.float32),
                        atol=1e-2, rtol=1e-2)

    print("KERNEL_OK")
</pallas_src>

<mosaic_0001>
module attributes {stable_mosaic.version = 11 : i64} {
  func.func @_mul_table_kernel(%arg0: i32, %arg1: memref<3x16x384xf32, #tpu.memory_space<vmem>>, %arg2: memref<16x384xf32, #tpu.memory_space<vmem>>) attributes {dimension_semantics = [#tpu.dimension_semantics<parallel>], iteration_bounds = array<i64: 2>, scalar_prefetch = 0 : i64, scratch_operands = 0 : i64, tpu.core_type = #tpu.core_type<tc>, window_params = [{transform_indices = @transform_0, window_bounds = array<i64: 3, 16, 384>}, {transform_indices = @transform_1, window_bounds = array<i64: 16, 384>}]} {
    %c0 = arith.constant 0 : index
    %c0_0 = arith.constant 0 : index
    %c0_1 = arith.constant 0 : index
    %0 = vector.load %arg1[%c0, %c0_0, %c0_1] : memref<3x16x384xf32, #tpu.memory_space<vmem>>, vector<1x16x384xf32>
    %1 = vector.shape_cast %0 : vector<1x16x384xf32> to vector<16x384xf32>
    %c1 = arith.constant 1 : index
    %c0_2 = arith.constant 0 : index
    %c0_3 = arith.constant 0 : index
    %2 = vector.load %arg1[%c1, %c0_2, %c0_3] : memref<3x16x384xf32, #tpu.memory_space<vmem>>, vector<1x16x384xf32>
    %3 = vector.shape_cast %2 : vector<1x16x384xf32> to vector<16x384xf32>
    %4 = arith.mulf %1, %3 : vector<16x384xf32>
    %c2 = arith.constant 2 : index
    %c0_4 = arith.constant 0 : index
    %c0_5 = arith.constant 0 : index
    %5 = vector.load %arg1[%c2, %c0_4, %c0_5] : memref<3x16x384xf32, #tpu.memory_space<vmem>>, vector<1x16x384xf32>
    %6 = vector.shape_cast %5 : vector<1x16x384xf32> to vector<16x384xf32>
    %7 = arith.mulf %4, %6 : vector<16x384xf32>
    %c0_6 = arith.constant 0 : index
    %c0_7 = arith.constant 0 : index
    %8 = vector.load %arg2[%c0_6, %c0_7] : memref<16x384xf32, #tpu.memory_space<vmem>>, vector<16x384xf32>
    tpu.vector_store %arg2[%c0_6, %c0_7], %7 {strides = array<i32>} : memref<16x384xf32, #tpu.memory_space<vmem>>, vector<16x384xf32>,
    return
  }
  func.func @transform_0(%arg0: i32) -> (i32, i32, i32) {
    %c0_i32 = arith.constant 0 : i32
    %c0_i32_0 = arith.constant 0 : i32
    %c0_i32_1 = arith.constant 0 : i32
    return %c0_i32, %arg0, %c0_i32_0 : i32, i32, i32
  }
  func.func @transform_1(%arg0: i32) -> (i32, i32) {
    %c0_i32 = arith.constant 0 : i32
    %c0_i32_0 = arith.constant 0 : i32
    return %arg0, %c0_i32 : i32, i32
  }
}

</mosaic_0001>

<bundles_post_ra>
// kernel: tpu_custom_call.1
= control target key start
LH: loop header
LB: loop body
LE: loop exit
PB: predicated region body
PF: predicated region fallthrough
CT: control target
= control target key end

     0   :  { %6 = vsyncpa [#allocation4], 0  ;;  %s940_s0 = inlined_call_operand.vmem [shape: f32[4,20,384], index: 0, kind: input, shape index: {}]   ;;  %s941_s1 = inlined_call_operand.hbm [shape: f32[20,384], index: 1, kind: output, shape index: {}]  }
   0x1   :  { %8 = vsyncpa [#allocation4 + $0x1], 0  ;;  %s687_s6 = smov 0   ;;  %s689_s7 = smov 0  }
   0x2   :  { %s691_s8 = smov 0   ;;  %s693_s9 = smov 0  }
   0x3 LB: > { %s708_s10 = sadd.s32 4294967295, %s640_s9   ;;  %s403_s11 = sadd.s32 4294967294, %s640_s9   ;;  %s640_s9 = sphi %s693_s9, %s953_s9   ;;  %s636_s8 = sphi %s691_s8, %s952_s8   ;;  %s632_s7 = sphi %s689_s7, %s951_s7   ;;  %s628_s6 = sphi %s687_s6, %s950_s6  }
   0x4   : > { %s712_s12 = sadd.s32 1, %s640_s9   ;;  %s21_s13 = sadd.s32 1, %s636_s8 }
   0x5   : > { %s18_s14 = ssub.s32 %s640_s9, %s712_s12  ;;  %p28_p0 = scmp.ne.s32.totalorder %s636_s8, %s632_s7 }
   0x6   : > { %p19_p1 = scmp.eq.s32.totalorder %s18_s14, 0  ;;  %p29_p2 = scmp.eq.s32.totalorder %s640_s9, 0 }
   0x7   : > { %p58_p3 = scmp.eq.s32.totalorder %s708_s10, 1  ;;  %p63_p4 = scmp.ne.s32.totalorder %s632_s7, %s628_s6 }
   0x8   : > { %s724_s15 = scalar_select %p19_p1, %s636_s8, %s21_s13  }
   0x9   : > { %p30_p5 = por %p29_p2, %p28_p0  ;;  %p726_p6 = por %p58_p3, %p28_p0 }
   0xa   : > { %p64_p7 = scmp.eq.s32.totalorder %s403_s11, 1  ;;  %p405_p9 = scmp.ge.s32.totalorder %s640_s9, 2 }
   0xc   : > { %p730_p8 = por %p64_p7, %p63_p4  ;;  %80 = sbr.rel (%p405_p9) target bundleno = 63 (0x3f), region = 16 }
  0x11   : > { %83 = sbr.rel (!%p30_p5) target bundleno = 63 (0x3f), region = 20  ;;  %s85_s18 = sand.u32 (%p30_p5), 1, %s636_s8  }
  0x12   : > { %s406_s19 = sshll.u32 (%p30_p5), %s640_s9, 1  ;;  %s439_s20 = smul.u32 (%p30_p5), 144, %s85_s18 }
  0x13   : > { %s89_s21 = ssub.s32 (%p30_p5), 3, %s406_s19  ;;  %s440_s22 = smul.u32 (%p30_p5), 48, %s640_s9 }
  0x14   : > { %p90_p10 = scmp.lt.s32.totalorder (%p30_p5), %s89_s21, 2  ;;  %s748_s27 = scalar_lea.vmem (%p30_p5), [#allocation2], %s439_s20  }
  0x15   : > { %s745_s25 = scalar_lea.vmem (%p30_p5), %s940_s0, %s440_s22  }
  0x16   : > { %s955_s21 = smov (!%p90_p10, %s89_s21), 2 }
  0x17   : > { %s407_s26 = smul.u32 1152, %s955_s21 }
  0x19   : > { %p411_p11 = scmp.eq.s32.totalorder %s407_s26, 0 }
  0x1a   : > { %s751_s28 = sshrl.u32 (!%p411_p11), %s955_s21, 1 }
  0x1b   : > { %100 = sbr.rel (%p411_p11) target bundleno = 63 (0x3f), region = 24  ;;  %p412_p12 = scmp.le.s32.totalorder (!%p411_p11), %s751_s28, 0 }
  0x20   : > { %359 = sbr.rel (%p412_p12) target bundleno = 47 (0x2f), region = 92  ;;  %s944_s29 = smov (!%p412_p12), %s748_s27 }
  0x21   : > { %s945_s30 = smov (!%p412_p12), %s745_s25  ;;  %s760_s2 = smov (!%p412_p12), 0  }
  0x22   : > { %s762_s3 = smov (!%p412_p12), 0  }
  0x25 LB: >> { %v113_v0 = vld [vmem:[%s648_s30] sm:$0xff]  ;;  %v115_v1 = vld [vmem:[%s648_s30 + $0x18] sm:$0xff]  ;;  %v117_v2 = vld [vmem:[%s648_s30 + $0x8] sm:$0xff]  ;;  %s149_s4 = sadd.s32 1, %s652_s2  ;;  %s107_s3 = sadd.s32 1, %s656_s3   ;;  %s656_s3 = sphi %s762_s3, %s107_s3   ;;  %s652_s2 = sphi %s760_s2, %s946_s2   ;;  %s648_s30 = sphi %s945_s30, %s154_s30   ;;  %s644_s29 = sphi %s944_s29, %s155_s29  }
  0x26   : >> { %114 = vst [vmem:[%s644_s29] sm:$0xff] %v113_v0  ;;  %116 = vst [vmem:[%s644_s29 + $0x18] sm:$0xff] %v115_v1  ;;  %v119_v3 = vld [vmem:[%s648_s30 + $0x20] sm:$0xff]  ;;  %v121_v4 = vld [vmem:[%s648_s30 + $0x10] sm:$0xff]  ;;  %p150_p13 = scmp.ge.s32.totalorder %s149_s4, %s751_s28  ;;  %p106_p0 = scmp.ge.s32.totalorder %s107_s3, %s751_s28 }
  0x27   : >> { %118 = vst [vmem:[%s644_s29 + $0x8] sm:$0xff] %v117_v2  ;;  %v123_v5 = vld [vmem:[%s648_s30 + $0x28] sm:$0xff]  ;;  %120 = vst [vmem:[%s644_s29 + $0x20] sm:$0xff] %v119_v3  ;;  %v127_v7 = vld [vmem:[%s648_s30 + $0x60] sm:$0xff] }
  0x28   : >> { %122 = vst [vmem:[%s644_s29 + $0x10] sm:$0xff] %v121_v4  ;;  %124 = vst [vmem:[%s644_s29 + $0x28] sm:$0xff] %v123_v5  ;;  %v125_v6 = vld [vmem:[%s648_s30 + $0x48] sm:$0xff]  ;;  %v129_v8 = vld [vmem:[%s648_s30 + $0x50] sm:$0xff]  ;;  %s957_s4 = smov (%p150_p13, %s149_s4), 0 }
  0x29   : >> { %126 = vst [vmem:[%s644_s29 + $0x30] sm:$0xff] %v125_v6  ;;  %128 = vst [vmem:[%s644_s29 + $0x48] sm:$0xff] %v127_v7  ;;  %v131_v9 = vld [vmem:[%s648_s30 + $0x68] sm:$0xff]  ;;  %v133_v10 = vld [vmem:[%s648_s30 + $0x58] sm:$0xff]  ;;  %s152_s5 = smul.u32 48, %s957_s4  ;;  %s946_s2 = smov %s957_s4 }
  0x2a   : >> { %130 = vst [vmem:[%s644_s29 + $0x38] sm:$0xff] %v129_v8  ;;  %v135_v11 = vld [vmem:[%s648_s30 + $0x70] sm:$0xff]  ;;  %132 = vst [vmem:[%s644_s29 + $0x50] sm:$0xff] %v131_v9  ;;  %v139_v13 = vld [vmem:[%s648_s30 + $0xa8] sm:$0xff]  ;;  %109 = sbr.rel (!%p106_p0) target bundleno = 37 (0x25), region = 98 }
  0x2b   : >> { %134 = vst [vmem:[%s644_s29 + $0x40] sm:$0xff] %v133_v10  ;;  %136 = vst [vmem:[%s644_s29 + $0x58] sm:$0xff] %v135_v11  ;;  %v137_v12 = vld [vmem:[%s648_s30 + $0x90] sm:$0xff]  ;;  %v141_v14 = vld [vmem:[%s648_s30 + $0x98] sm:$0xff] }
  0x2c   : >> { %138 = vst [vmem:[%s644_s29 + $0x60] sm:$0xff] %v137_v12  ;;  %140 = vst [vmem:[%s644_s29 + $0x78] sm:$0xff] %v139_v13  ;;  %v143_v15 = vld [vmem:[%s648_s30 + $0xb0] sm:$0xff]  ;;  %v145_v16 = vld [vmem:[%s648_s30 + $0xa0] sm:$0xff] }
  0x2d   : >> { %142 = vst [vmem:[%s644_s29 + $0x68] sm:$0xff] %v141_v14  ;;  %v147_v17 = vld [vmem:[%s648_s30 + $0xb8] sm:$0xff]  ;;  %144 = vst [vmem:[%s644_s29 + $0x80] sm:$0xff] %v143_v15  ;;  %s154_s30 = scalar_lea.vmem %s745_s25, %s152_s5  }
  0x2e   : >> { %146 = vst [vmem:[%s644_s29 + $0x70] sm:$0xff] %v145_v16  ;;  %148 = vst [vmem:[%s644_s29 + $0x88] sm:$0xff] %v147_v17  ;;  %s155_s29 = scalar_lea.vmem %s748_s27, %s152_s5 [#allocation2]  }
  0x2f PF: > { %s824_s11 = sand.u32 1, %s955_s21   ;;  %s414_s13 = smul.u32 48, %s751_s28 }
  0x30   : > { %p416_p1 = scmp.le.s32.totalorder %s824_s11, 0 }
  0x31   : > { %s828_s14 = scalar_lea.vmem %s745_s25, %s414_s13   ;;  %s831_s18 = scalar_lea.vmem %s748_s27, %s414_s13 [#allocation2]  }
  0x32   : > { %373 = sbr.rel (%p416_p1) target bundleno = 63 (0x3f), region = 103  ;;  %s947_s19 = smov (!%p416_p1), %s831_s18 }
  0x33   : > { %s948_s20 = smov (!%p416_p1), %s828_s14  ;;  %s840_s22 = smov (!%p416_p1), 0  }
  0x34   : > { %s842_s23 = smov (!%p416_p1), 0  }
  0x37 LB: >> { %v172_v18 = vld [vmem:[%s664_s20] sm:$0xff]  ;;  %v174_v19 = vld [vmem:[%s664_s20 + $0x8] sm:$0xff]  ;;  %v176_v20 = vld [vmem:[%s664_s20 + $0x10] sm:$0xff]  ;;  %s190_s21 = sadd.s32 1, %s668_s22  ;;  %s166_s23 = sadd.s32 1, %s672_s23   ;;  %s672_s23 = sphi %s842_s23, %s166_s23   ;;  %s668_s22 = sphi %s840_s22, %s949_s22   ;;  %s664_s20 = sphi %s948_s20, %s195_s20   ;;  %s660_s19 = sphi %s947_s19, %s196_s19  }
  0x38   : >> { %173 = vst [vmem:[%s660_s19] sm:$0xff] %v172_v18  ;;  %175 = vst [vmem:[%s660_s19 + $0x8] sm:$0xff] %v174_v19  ;;  %v178_v21 = vld [vmem:[%s664_s20 + $0x48] sm:$0xff]  ;;  %v180_v22 = vld [vmem:[%s664_s20 + $0x50] sm:$0xff]  ;;  %p191_p2 = scmp.ge.s32.totalorder %s190_s21, %s824_s11  ;;  %p165_p3 = scmp.ge.s32.totalorder %s166_s23, %s824_s11 }
  0x39   : >> { %177 = vst [vmem:[%s660_s19 + $0x10] sm:$0xff] %v176_v20  ;;  %v182_v23 = vld [vmem:[%s664_s20 + $0x58] sm:$0xff]  ;;  %179 = vst [vmem:[%s660_s19 + $0x30] sm:$0xff] %v178_v21  ;;  %v184_v24 = vld [vmem:[%s664_s20 + $0x90] sm:$0xff] }
  0x3a   : >> { %181 = vst [vmem:[%s660_s19 + $0x38] sm:$0xff] %v180_v22  ;;  %183 = vst [vmem:[%s660_s19 + $0x40] sm:$0xff] %v182_v23  ;;  %v186_v25 = vld [vmem:[%s664_s20 + $0x98] sm:$0xff]  ;;  %v188_v26 = vld [vmem:[%s664_s20 + $0xa0] sm:$0xff]  ;;  %s959_s21 = smov (%p191_p2, %s190_s21), 0  ;;  %168 = sbr.rel (!%p165_p3) target bundleno = 55 (0x37), region = 109 }
  0x3b   : >> { %185 = vst [vmem:[%s660_s19 + $0x60] sm:$0xff] %v184_v24  ;;  %187 = vst [vmem:[%s660_s19 + $0x68] sm:$0xff] %v186_v25  ;;  %s193_s24 = smul.u32 24, %s959_s21  ;;  %s949_s22 = smov %s959_s21 }
  0x3c   : >> { %189 = vst [vmem:[%s660_s19 + $0x70] sm:$0xff] %v188_v26 }
  0x3d   : >> { %s195_s20 = scalar_lea.vmem %s828_s14, %s193_s24   ;;  %s196_s19 = scalar_lea.vmem %s831_s18, %s193_s24 [#allocation2]  }
  0x3f PF: > { %p417_p4 = scmp.ge.s32.totalorder %s640_s9, 1  ;;  %p201_p5 = scmp.lt.s32.totalorder %s640_s9, 3 }
  0x41   : > { %p202_p7 = pnand %p417_p4, %p201_p5 }
  0x42   : > { %s866_s25 = sand.u32 (!%p202_p7), 1, %s632_s7  }
  0x43   : > { %205 = sbr.rel (%p202_p7) target bundleno = 111 (0x6f), region = 50  ;;  %s278_s30 = scalar_lea.sflag (!%p202_p7), [#allocation4], %s866_s25 }
  0x44   : > { %s441_s26 = smul.u32 (!%p202_p7), 144, %s866_s25 }
  0x45   : > { %s442_s27 = smul.u32 (!%p202_p7), 48, %s866_s25 }
  0x46   : > { %s210_s28 = scalar_lea.vmem (!%p202_p7), [#allocation2], %s441_s26 }
  0x47   : > { %s870_s29 = scalar_lea.vmem (!%p202_p7), [#allocation3], %s442_s27 }
  0x48   : > { %v239_v27 = vld [vmem:[%s210_s28] sm:$0xff]  ;;  %v418_v28 = vld [vmem:[%s210_s28 + $0x30] sm:$0xff]  ;;  %v240_v31 = vld [vmem:[%s210_s28 + $0x8] sm:$0xff]  ;;  %s430_s2 = sshll.u32 (%p726_p6), %s708_s10, 1 }
  0x49   : > { %v424_v29 = vld [vmem:[%s210_s28 + $0x60] sm:$0xff]  ;;  %v252_v30 = vmul.f32 %v418_v28, %v239_v27  ;;  %v419_v32 = vld [vmem:[%s210_s28 + $0x38] sm:$0xff]  ;;  %v425_v33 = vld [vmem:[%s210_s28 + $0x68] sm:$0xff]  ;;  %s286_s3 = ssub.s32 (%p726_p6), 3, %s430_s2 }
  0x4a   : > { %v253_v34 = vmul.f32 %v419_v32, %v240_v31  ;;  %v241_v35 = vld [vmem:[%s210_s28 + $0x10] sm:$0xff]  ;;  %v420_v36 = vld [vmem:[%s210_s28 + $0x40] sm:$0xff]  ;;  %v242_v40 = vld [vmem:[%s210_s28 + $0x18] sm:$0xff]  ;;  %p287_p10 = scmp.lt.s32.totalorder (%p726_p6), %s286_s3, 2 }
  0x4b   : > { %v426_v37 = vld [vmem:[%s210_s28 + $0x70] sm:$0xff]  ;;  %v265_v38 = vmul.f32 %v424_v29, %v252_v30  ;;  %v254_v39 = vmul.f32 %v420_v36, %v241_v35  ;;  %v421_v41 = vld [vmem:[%s210_s28 + $0x48] sm:$0xff]  ;;  %v427_v42 = vld [vmem:[%s210_s28 + $0x78] sm:$0xff] }
  0x4c   : > { %v266_v43 = vmul.f32 %v425_v33, %v253_v34  ;;  %v255_v44 = vmul.f32 %v421_v41, %v242_v40  ;;  %v243_v45 = vld [vmem:[%s210_s28 + $0x20] sm:$0xff]  ;;  %v422_v46 = vld [vmem:[%s210_s28 + $0x50] sm:$0xff]  ;;  %v244_v50 = vld [vmem:[%s210_s28 + $0x28] sm:$0xff] }
  0x4d   : > { %v428_v47 = vld [vmem:[%s210_s28 + $0x80] sm:$0xff]  ;;  %271 = vst [vmem:[%s870_s29] sm:$0xff] %v265_v38  ;;  %v267_v48 = vmul.f32 %v426_v37, %v254_v39  ;;  %v256_v49 = vmul.f32 %v422_v46, %v243_v45  ;;  %v423_v51 = vld [vmem:[%s210_s28 + $0x58] sm:$0xff]  ;;  %v429_v52 = vld [vmem:[%s210_s28 + $0x88] sm:$0xff] }
  0x4e   : > { %272 = vst [vmem:[%s870_s29 + $0x8] sm:$0xff] %v266_v43  ;;  %v268_v53 = vmul.f32 %v427_v42, %v255_v44  ;;  %v257_v54 = vmul.f32 %v423_v51, %v244_v50  ;;  %284 = sbr.rel (!%p726_p6) target bundleno = 111 (0x6f), region = 58 }
  0x4f   : > { %273 = vst [vmem:[%s870_s29 + $0x10] sm:$0xff] %v267_v48  ;;  %v269_v55 = vmul.f32 %v428_v47, %v256_v49 }
  0x50   : > { %274 = vst [vmem:[%s870_s29 + $0x18] sm:$0xff] %v268_v53  ;;  %v270_v56 = vmul.f32 %v429_v52, %v257_v54 }
  0x51   : > { %275 = vst [vmem:[%s870_s29 + $0x20] sm:$0xff] %v269_v55 }
  0x52   : > { %276 = vst [vmem:[%s870_s29 + $0x28] sm:$0xff] %v270_v56 }
  0x53   : > { %s961_s3 = smov (!%p287_p10, %s286_s3), 2 }
  0x54   : > { %s882_s4 = smul.u32 384, %s961_s3 }
  0x56   : > { %s292_s5 = ssub.s32 768, %s882_s4 }
  0x57   : > { %293 = vsyncadd %s278_s30, %s292_s5  ;;  %p433_p11 = scmp.ne.s32.totalorder %s882_s4, 0  ;;  %s443_s16 = smul.u32 768, %s708_s10 }
  0x58   : > { %s299_s11 = sshll.u32 %s870_s29, 4  ;;  %s674_s20 = smov [#allocation3]   ;;  %s895_s11 = int_to_ptr.vmem [resolvable:$true] %s299_s11 }
  0x59   : > { %s893_s18 = scalar_lea.hbm %s941_s1, %s443_s16  ;;  %s548_s19 = scalar_lea.vmem %s895_s11, %s882_s4 }
  0x5a   : > { %p549_p6 = scmp.ne.s32.totalorder %s895_s11, %s548_s19  ;;  %s552_s22 = sshll.u32 %s674_s20, 4  ;;  %s553_s22 = int_to_ptr.vmem [resolvable:$false] %s552_s22 }
  0x5b   : > { %s554_s10 = scalar_lea.vmem %s553_s22, 1536  ;;  %p555_p0 = scmp.lt.s32.totalorder %s895_s11, %s553_s22 }
  0x5c   : > { %p550_p12 = pnand %p549_p6, %p433_p11  ;;  %p556_p1 = scmp.lt.s32.totalorder %s554_s10, %s548_s19 }
  0x5e   : > { %p551_p13 = pneg %p550_p12  ;;  %p557_p2 = por %p556_p1, %p555_p0 }
  0x60   : > { %p558_p3 = pnand %p557_p2, %p551_p13 }
  0x62   : > { %561 = shalt.err (!%p558_p3)
}
  0x63   : > { %s562_s23 = scalar_lea.hbm %s893_s18, %s882_s4  ;;  %s566_s26 = scalar_lea.hbm %s941_s1, 1152 }
  0x64   : > { %p563_p4 = scmp.ne.s32.totalorder %s893_s18, %s562_s23  ;;  %p567_p10 = scmp.lt.s32.totalorder %s893_s18, %s941_s1 }
  0x65   : > { %p568_p6 = scmp.lt.s32.totalorder %s566_s26, %s562_s23 }
  0x66   : > { %p564_p5 = pnand %p563_p4, %p433_p11 }
  0x67   : > { %p569_p12 = por %p568_p6, %p567_p10 }
  0x68   : > { %p565_p7 = pneg %p564_p5 }
  0x6a   : > { %p570_p13 = pnand %p569_p12, %p565_p7 }
  0x6c   : > { %573 = shalt.err (!%p570_p13)
}
  0x6d   : > { %s675_s29 = smov 384   ;;  %s676_s2 = smov 24  }
  0x6e   : > { %305 = dma.vmem_to_hbm [thread:$0]  (%p433_p11), %s895_s11, %s882_s4, %s893_s18, %s278_s30, %s675_s29, %s675_s29, %s676_s2  }
  0x6f PF: > { %s314_s3 = sand.u32 1, %s628_s6   ;;  %p446_p0 = pnand %p405_p9, %p730_p8 }
  0x70   : > { %s315_s5 = scalar_lea.sflag [#allocation4], %s314_s3 }
  0x71   : > { %p447_p1 = pneg %p446_p0 }
  0x73   : > { %623 = dma.done.wait (%p447_p1), %s315_s5, 768  }
  0x74   : > { %625 = vsyncadd (%p447_p1), %s315_s5, 4294966528  ;;  %p11_p2 = scmp.ge.s32.totalorder %s712_s12, 4   ;;  %s950_s6 = smov %s632_s7 }
  0x75   : > { %s951_s7 = smov %s636_s8  ;;  %s952_s8 = smov %s724_s15 }
  0x76   : > { %s953_s9 = smov %s712_s12  ;;  %13 = sbr.rel (!%p11_p2) target bundleno = 3 (0x3), region = 120 }
  0x7b   :  { %320 = vsyncpa [#allocation4], 1 }
  0x7c   :  { %322 = vsyncpa [#allocation4 + $0x1], 1 }

</bundles_post_ra>
